<compile_context>
chip_gen: v6e
topology: v6e:2x2x1
jax: 0.10.0
libtpu: 0.0.40
codegen_flags: <defaults>
</compile_context>

<pallas_src>
import math

import jax
import jax.numpy as jnp
from jax.experimental import pallas as pl
from jax.experimental.pallas import tpu as pltpu

_MIB = 1024 * 1024


def _vmem_capacity_bytes(default=64 * _MIB):
    """Physical VMEM of the attached TPU; conservative 64 MiB fallback (v7x)."""
    try:
        info = pltpu.get_tpu_info()
        cap = int(getattr(info, "vmem_capacity_bytes", 0) or 0)
        if cap > 0:
            return cap
    except Exception:
        pass
    return default


def _is_pre_v6_chip():
    """True for chips without a bf16 VPU path (v5e and older), or if unknown."""
    try:
        kind = jax.devices()[0].device_kind.lower()
        return any(tag in kind for tag in ("v2", "v3", "v4", "v5"))
    except Exception:
        return True  # conservative: keep the f32 compute path


def _sublane_multiple(dtype):
    """Native sublane packing: 8 for 32-bit, 16 for bf16, 32 for 8-bit dtypes."""
    return max(8, 32 // jnp.dtype(dtype).itemsize)


def _choose_fold(rows, size_in, max_w):
    """Pick fold K (W = K*size_in) and row padding.

    Prefers the largest divisor K of `rows` with W <= max_w and W % 128 == 0.
    If no dividing fold is 128-aligned, pads rows up so an aligned W can be
    used anyway (lane-dense stores are the biggest store-side lever).
    Returns (k, pad_rows).
    """
    best = 1
    best_aligned = None
    for k in range(1, rows + 1):
        w = k * size_in
        if w > max_w:
            break
        if rows % k:
            continue
        best = k
        if w % 128 == 0:
            best_aligned = k
    if best_aligned is not None:
        return best_aligned, 0

    # Fallback: smallest K0 making W 128-aligned, scaled up while it fits.
    k0 = 128 // math.gcd(size_in, 128)
    if k0 * size_in <= max_w:
        k_fit = max_w // (k0 * size_in)          # how many K0 multiples fit in max_w
        k_cov = -(-rows // k0)                    # enough to cover all rows
        k = k0 * max(1, min(k_fit, k_cov))
        pad = (-rows) % k
        return k, pad
    return best, 0


def _choose_tile_rows(rows2, w, itemsize, target_bytes, sub):
    """Rows per grid step: ~target_bytes per block, multiple of `sub` (or full)."""
    if rows2 * w * itemsize <= target_bytes:
        return rows2  # single block == full array dims (always legal)
    t = (target_bytes // (w * itemsize)) // sub * sub
    t = max(sub, t)
    return min(t, rows2)


def _make_soft_relu_kernel(compute_dtype):
    def kernel(x_ref, a_ref, o_ref):
        # x_ref: (tile_rows, W) block of the flattened input.
        # a_ref: (1, W) VMEM-resident alphas, broadcast over rows.
        x = x_ref[...].astype(compute_dtype)
        a = a_ref[...].astype(compute_dtype)
        o_ref[...] = jnp.maximum(x - a, 0.0).astype(o_ref.dtype)
    return kernel


def soft_relu(x, alphas, *, max_lane_width=8192, target_block_bytes=None):
    """Pallas implementation of softReLu.forward: max(0, x - alphas).

    x:      (..., size_in) array.
    alphas: (size_in,) per-feature learnable offsets.
    Output dtype matches x.dtype (same contract as the previous version).
    """
    size_in = alphas.shape[0]
    assert x.shape[-1] == size_in, "last dim of x must equal size_in"

    orig_shape = x.shape
    rows = x.size // size_in

    # --- Chip-aware block sizing (HBM-bound op => big blocks, raised VMEM cap).
    vmem_cap = _vmem_capacity_bytes()
    if target_block_bytes is None:
        # ~8 MiB on 128 MiB-VMEM parts (v5e/v6e), ~6 MiB on 64 MiB-VMEM v7x.
        target_block_bytes = min(8 * _MIB, vmem_cap // 10)
    vmem_limit_bytes = min((vmem_cap * 3) // 4, 64 * _MIB)

    # --- Compute dtype: native bf16 on v6e/v7x, f32 elsewhere / for other types.
    x_dt = jnp.dtype(x.dtype)
    if x_dt == jnp.dtype(jnp.float32):
        compute_dtype = jnp.float32
    elif x_dt == jnp.dtype(jnp.bfloat16) and not _is_pre_v6_chip():
        compute_dtype = jnp.bfloat16
    else:
        compute_dtype = jnp.float32

    # --- Lane-dense slab: (rows2, W) with W = K * size_in (128-aligned if possible).
    k, pad = _choose_fold(rows, size_in, max_lane_width)
    w = k * size_in
    xf = x.reshape(rows, size_in)
    if pad:
        xf = jnp.pad(xf, ((0, pad), (0, 0)))
    rows_p = rows + pad
    rows2 = rows_p // k

    x2d = xf.reshape(rows2, w)
    a_wide = jnp.tile(alphas, k).reshape(1, w)

    itemsize = x_dt.itemsize
    sub = _sublane_multiple(x_dt)
    tile_rows = _choose_tile_rows(rows2, w, itemsize, target_block_bytes, sub)
    grid = (pl.cdiv(rows2, tile_rows),)

    out2d = pl.pallas_call(
        _make_soft_relu_kernel(compute_dtype),
        out_shape=jax.ShapeDtypeStruct((rows2, w), x.dtype),
        grid=grid,
        in_specs=[
            pl.BlockSpec((tile_rows, w), lambda i: (i, 0)),   # x tile (double-buffered)
            pl.BlockSpec((1, w), lambda i: (0, 0)),           # alphas: constant block, fetched once
        ],
        out_specs=pl.BlockSpec((tile_rows, w), lambda i: (i, 0)),
        compiler_params=pltpu.CompilerParams(
            dimension_semantics=("parallel",),
            vmem_limit_bytes=vmem_limit_bytes,
        ),
    )(x2d, a_wide)

    out = out2d.reshape(rows_p, size_in)
    if pad:
        out = out[:rows]
    return out.reshape(orig_shape)


if __name__ == "__main__":
    key = jax.random.PRNGKey(0)
    kx, ka = jax.random.split(key)

    # Shapes implied by the forward: x = (batch, seq, hidden), alphas = (hidden,)
    B, S, H = 2, 8, 32
    x = jax.random.normal(kx, (B, S, H), dtype=jnp.float32)

    # Matches the PyTorch init: constant_(alphas, 1e-9)
    alphas = jnp.full((H,), 1e-9, dtype=jnp.float32)
    out = jax.block_until_ready(soft_relu(x, alphas))
    ref = jnp.maximum(jnp.zeros((H,), jnp.float32), x - alphas)
    assert out.shape == x.shape and out.dtype == x.dtype
    assert bool(jnp.allclose(out, ref, atol=1e-6, rtol=1e-6))

    # Non-trivial alphas to exercise the broadcasted subtract.
    alphas2 = 0.1 * jax.random.normal(ka, (H,), dtype=jnp.float32)
    out2 = jax.block_until_ready(soft_relu(x, alphas2))
    ref2 = jnp.maximum(jnp.zeros((H,), jnp.float32), x - alphas2)
    assert bool(jnp.allclose(out2, ref2, atol=1e-6, rtol=1e-6))

    # Odd feature width (forces the padded 128-aligned fold path) + bf16 path.
    H3 = 24
    x3 = jax.random.normal(kx, (3, 7, H3), dtype=jnp.bfloat16)
    alphas3 = (0.05 * jax.random.normal(ka, (H3,), dtype=jnp.float32)).astype(jnp.bfloat16)
    out3 = jax.block_until_ready(soft_relu(x3, alphas3))
    ref3 = jnp.maximum(jnp.zeros((H3,), jnp.bfloat16), x3 - alphas3)
    assert out3.shape == x3.shape and out3.dtype == x3.dtype
    assert bool(jnp.allclose(out3.astype(jnp.float32), ref3.astype(jnp.float32),
                             atol=1e-2, rtol=1e-2))

    print("KERNEL_OK")
</pallas_src>

<mosaic_0001>
module attributes {stable_mosaic.version = 11 : i64} {
  func.func @kernel(%arg0: i32, %arg1: memref<1x512xf32, #tpu.memory_space<vmem>>, %arg2: memref<1x512xf32, #tpu.memory_space<vmem>>, %arg3: memref<1x512xf32, #tpu.memory_space<vmem>>) attributes {dimension_semantics = [#tpu.dimension_semantics<parallel>], iteration_bounds = array<i64: 1>, scalar_prefetch = 0 : i64, scratch_operands = 0 : i64, tpu.core_type = #tpu.core_type<tc>, window_params = [{transform_indices = @transform_0, window_bounds = array<i64: 1, 512>}, {pipeline_mode = #tpu.pipeline_mode<synchronous>, transform_indices = @transform_1, window_bounds = array<i64: 1, 512>}, {transform_indices = @transform_2, window_bounds = array<i64: 1, 512>}]} {
    %c0 = arith.constant 0 : index
    %c0_0 = arith.constant 0 : index
    %0 = vector.load %arg1[%c0, %c0_0] : memref<1x512xf32, #tpu.memory_space<vmem>>, vector<1x512xf32>
    %c0_1 = arith.constant 0 : index
    %c0_2 = arith.constant 0 : index
    %1 = vector.load %arg2[%c0_1, %c0_2] : memref<1x512xf32, #tpu.memory_space<vmem>>, vector<1x512xf32>
    %2 = arith.subf %0, %1 : vector<1x512xf32>
    %cst = arith.constant 0.000000e+00 : f32
    %3 = vector.broadcast %cst : f32 to vector<1x512xf32>
    %4 = arith.maximumf %2, %3 : vector<1x512xf32>
    %c0_3 = arith.constant 0 : index
    %c0_4 = arith.constant 0 : index
    %5 = vector.load %arg3[%c0_3, %c0_4] : memref<1x512xf32, #tpu.memory_space<vmem>>, vector<1x512xf32>
    tpu.vector_store %arg3[%c0_3, %c0_4], %4 {strides = array<i32>} : memref<1x512xf32, #tpu.memory_space<vmem>>, vector<1x512xf32>,
    return
  }
  func.func @transform_0(%arg0: i32) -> (i32, i32) {
    %c0_i32 = arith.constant 0 : i32
    %c0_i32_0 = arith.constant 0 : i32
    return %arg0, %c0_i32 : i32, i32
  }
  func.func @transform_1(%arg0: i32) -> (i32, i32) {
    %c0_i32 = arith.constant 0 : i32
    %c0_i32_0 = arith.constant 0 : i32
    %c0_i32_1 = arith.constant 0 : i32
    return %c0_i32, %c0_i32_0 : i32, i32
  }
  func.func @transform_2(%arg0: i32) -> (i32, i32) {
    %c0_i32 = arith.constant 0 : i32
    %c0_i32_0 = arith.constant 0 : i32
    return %arg0, %c0_i32 : i32, i32
  }
}

</mosaic_0001>

<bundles_post_ra>
// kernel: tpu_custom_call.1
= control target key start
LH: loop header
LB: loop body
LE: loop exit
PB: predicated region body
PF: predicated region fallthrough
CT: control target
= control target key end

     0   :  { %7 = vsyncpa [#allocation3], 0  ;;  %s157_s0 = inlined_call_operand.hbm [shape: f32[1,512], index: 0, kind: input, shape index: {}]   ;;  %s158_s1 = inlined_call_operand.hbm [shape: f32[1,512], index: 1, kind: input, shape index: {}]   ;;  %s159_s2 = inlined_call_operand.hbm [shape: f32[1,512], index: 2, kind: output, shape index: {}]  }
   0x1   :  { %8 = vsyncpa [#allocation6], 0 }
   0x2   :  { %9 = vsyncpa [#allocation4], 0  ;;  %s130_s9 = smov [#allocation2]   ;;  %s131_s11 = smov [#allocation5]  }
   0x3   :  { %s16_s10 = sshll.u32 %s130_s9, 4  ;;  %s26_s12 = sshll.u32 %s131_s11, 4  ;;  %s17_s10 = int_to_ptr.vmem [resolvable:$true] %s16_s10  ;;  %s27_s12 = int_to_ptr.vmem [resolvable:$true] %s26_s12 }
   0x4   :  { %s72_s13 = scalar_lea.vmem %s17_s10, 64  ;;  %p77_p1 = scmp.lt.s32.totalorder %s17_s10, %s17_s10 }
   0x5   :  { %p73_p0 = scmp.ne.s32.totalorder %s17_s10, %s72_s13  ;;  %p78_p2 = scmp.lt.s32.totalorder %s72_s13, %s72_s13 }
   0x7   :  { %p79_p3 = por %p78_p2, %p77_p1 }
   0x9   :  { %p80_p4 = pnand %p79_p3, %p73_p0 }
   0xb   :  { %83 = shalt.err (!%p80_p4)
}
   0xc   :  { %19 = dma.hbm_to_vmem [thread:$0]  %s157_s0, 64, %s17_s10, [#allocation3]  }
   0xd   :  { %s92_s16 = scalar_lea.vmem %s27_s12, 64  ;;  %p97_p6 = scmp.lt.s32.totalorder %s27_s12, %s27_s12 }
   0xe   :  { %p93_p5 = scmp.ne.s32.totalorder %s27_s12, %s92_s16  ;;  %p98_p7 = scmp.lt.s32.totalorder %s92_s16, %s92_s16 }
  0x10   :  { %p99_p8 = por %p98_p7, %p97_p6 }
  0x12   :  { %p100_p9 = pnand %p99_p8, %p93_p5 }
  0x14   :  { %103 = shalt.err (!%p100_p9)
}
  0x15   :  { %29 = dma.hbm_to_vmem [thread:$0]  %s158_s1, 64, %s27_s12, [#allocation6]  }
  0x16   :  { %124 = dma.done.wait [#allocation3], 64  }
  0x17   :  { %125 = vsyncadd [#allocation3], 4294967232 }
  0x18   :  { %126 = dma.done.wait [#allocation6], 64  }
  0x19   :  { %127 = vsyncadd [#allocation6], 4294967232  ;;  %v40_v0 = vlaneseq  ;;  %v36_v1 = vld [vmem:[#allocation2] sm:$0xf]  ;;  %v37_v2 = vld [vmem:[#allocation5] sm:$0xf] }
  0x1a   :  { %s132_s19 = smov [#allocation7]   ;;  %v38_v3 = vsub.f32 %v36_v1, %v37_v2 }
  0x1b   :  { %s51_s0 = sshll.u32 %s132_s19, 4  ;;  %vm42_vm0 = vcmp.lt.s32.totalorder %v40_v0, 512  ;;  %s52_s0 = int_to_ptr.vmem [resolvable:$true] %s51_s0 }
  0x1c   :  { %v39_v4 = vmax.f32 %v38_v3, 0.0  ;;  %s104_s20 = scalar_lea.vmem %s52_s0, 64  ;;  %p109_p11 = scmp.lt.s32.totalorder %s52_s0, %s52_s0 }
  0x1d   :  { %p105_p10 = scmp.ne.s32.totalorder %s52_s0, %s104_s20  ;;  %p110_p12 = scmp.lt.s32.totalorder %s104_s20, %s104_s20 }
  0x1e   :  { %44 = vst.msk [vmem:[#allocation7] sm:$0xf] %vm42_vm0, %v39_v4 }
  0x1f   :  { %p111_p13 = por %p110_p12, %p109_p11 }
  0x21   :  { %p112_p0 = pnand %p111_p13, %p105_p10 }
  0x23   :  { %115 = shalt.err (!%p112_p0)
}
  0x24   :  { %54 = dma.vmem_to_hbm [thread:$0]  %s52_s0, 64, %s159_s2, [#allocation4]  }
  0x25   :  { %128 = dma.done.wait [#allocation4], 64  }
  0x26   :  { %129 = vsyncadd [#allocation4], 4294967232 }
  0x27   :  { %58 = vsyncpa [#allocation3], 1 }
  0x28   :  { %59 = vsyncpa [#allocation6], 1 }
  0x29   :  { %60 = vsyncpa [#allocation4], 1 }

</bundles_post_ra>
